<compile_context>
chip_gen: v6e
topology: v6e:2x2x1
jax: 0.10.0
libtpu: 0.0.40
codegen_flags: <defaults>
</compile_context>

<pallas_src>
import functools

import jax
import jax.numpy as jnp
from jax.experimental import pallas as pl
from jax.experimental.pallas import tpu as pltpu

# ---------------- model config (small, consistent with the module) ----------------
B = 2          # batch
S = 8          # sequence length
D = 32         # d_model
N_HEAD = 4     # n_head
HEAD_DIM = D // N_HEAD
LN_EPS = 1e-5
DROPOUT = 0.1  # inference mode -> identity (nn.Dropout is a no-op in eval)


def _self_attention_kernel(x_ref, w_qkv_ref, b_qkv_ref, wo_ref, vec_ref, o_ref,
                           *, n_head, eps):
    """One grid step = one batch element (block (1, S, D)).

    vec_ref rows: 0 = out-proj bias, 1 = LN gamma, 2 = LN beta.
    w_qkv_ref: (H, D, 3*hd) head-batched fused QKV weight (Q columns pre-scaled).
    b_qkv_ref: (H, 1, 3*hd) matching fused bias.
    wo_ref:    (H, hd, D) head-sliced Wo^T.
    """
    x = x_ref[0]                                    # (S, D) residual / identity
    s, d = x.shape
    hd = d // n_head

    bo = vec_ref[0:1, :]                            # (1, D) out-proj bias
    gamma = vec_ref[1:2, :]                         # (1, D) LN gamma
    beta = vec_ref[2:3, :]                          # (1, D) LN beta

    # ---- LayerNorm over d_model (f32) ----
    mean = jnp.mean(x, axis=-1, keepdims=True)
    cent = x - mean
    var = jnp.mean(cent * cent, axis=-1, keepdims=True)
    xn = cent * jax.lax.rsqrt(var + eps) * gamma + beta            # (S, D)

    # ---- head-batched fused QKV projection (head split baked into weight layout,
    #      so q/k/v come out head-major with zero in-kernel transposes) ----
    xn_b = jnp.broadcast_to(xn[None], (n_head, s, d))              # (H, S, D)
    qkv = jnp.einsum("hsd,hdf->hsf", xn_b, w_qkv_ref[...],
                     preferred_element_type=jnp.float32) + b_qkv_ref[...]  # (H,S,3hd)

    q = qkv[:, :, 0:hd]                                            # (H, S, hd) pre-scaled
    k = qkv[:, :, hd:2 * hd]                                       # (H, S, hd)
    v = qkv[:, :, 2 * hd:3 * hd]                                   # (H, S, hd)

    # ---- attention (softmax in f32, 1/sum folded into PV) ----
    scores = jnp.einsum("hqd,hkd->hqk", q, k,
                        preferred_element_type=jnp.float32)        # (H, S, S)
    m = jnp.max(scores, axis=-1, keepdims=True)
    p = jnp.exp(scores - m)
    r = pl.reciprocal(jnp.sum(p, axis=-1, keepdims=True), approx=True)
    pv = jnp.einsum("hqk,hkd->hqd", p, v,
                    preferred_element_type=jnp.float32) * r        # (H, S, hd)

    # ---- output projection: sum_h pv_h @ Wo^T[h]  ==  concat(heads) @ Wo^T ----
    proj = jnp.einsum("hqd,hdo->hqo", pv, wo_ref[...],
                      preferred_element_type=jnp.float32)          # (H, S, D)
    out = jnp.sum(proj, axis=0) + bo + x                           # + out bias + residual

    # TODO(synk): nn.Dropout is identity at inference; training-mode dropout not emulated.
    o_ref[0] = out


def pack_params(params, n_head):
    """One-time, parameter-load-time packing (hoisted out of the per-call path)."""
    d = params["ln_weight"].shape[0]
    hd = d // n_head
    scale = 1.0 / float(hd) ** 0.5
    w = params["in_proj_weight"]                                   # (3D, D) rows [q|k|v]
    b = params["in_proj_bias"]                                     # (3D,)

    wq = (w[0:d].reshape(n_head, hd, d) * scale).transpose(0, 2, 1)   # (H, D, hd)
    wk = w[d:2 * d].reshape(n_head, hd, d).transpose(0, 2, 1)         # (H, D, hd)
    wv = w[2 * d:3 * d].reshape(n_head, hd, d).transpose(0, 2, 1)     # (H, D, hd)
    w_qkv_h = jnp.concatenate([wq, wk, wv], axis=-1)                  # (H, D, 3hd)

    bq = b[0:d].reshape(n_head, hd) * scale
    bk = b[d:2 * d].reshape(n_head, hd)
    bv = b[2 * d:3 * d].reshape(n_head, hd)
    b_qkv_h = jnp.concatenate([bq, bk, bv], axis=-1)[:, None, :]      # (H, 1, 3hd)

    wo_h = params["out_proj_weight"].T.reshape(n_head, hd, d)         # (H, hd, D)
    vecs = jnp.stack([params["out_proj_bias"],
                      params["ln_weight"],
                      params["ln_bias"]])                             # (3, D)
    return {"w_qkv_h": w_qkv_h, "b_qkv_h": b_qkv_h, "wo_h": wo_h, "vecs": vecs}


def self_attention_pallas(x, packed):
    """x: (B, S, D) float32. packed: output of pack_params() (pre-packed weights)."""
    b, s, d = x.shape
    h, hd, _ = packed["wo_h"].shape

    kernel = functools.partial(_self_attention_kernel, n_head=h, eps=LN_EPS)

    return pl.pallas_call(
        kernel,
        out_shape=jax.ShapeDtypeStruct((b, s, d), jnp.float32),
        grid=(b,),
        in_specs=[
            pl.BlockSpec((1, s, d), lambda i: (i, 0, 0)),           # x (per-batch block)
            pl.BlockSpec((h, d, 3 * hd), lambda i: (0, 0, 0)),      # fused QKV weight
            pl.BlockSpec((h, 1, 3 * hd), lambda i: (0, 0, 0)),      # fused QKV bias
            pl.BlockSpec((h, hd, d), lambda i: (0, 0, 0)),          # Wo^T (head-sliced)
            pl.BlockSpec((3, d), lambda i: (0, 0)),                 # [out bias; gamma; beta]
        ],
        out_specs=pl.BlockSpec((1, s, d), lambda i: (i, 0, 0)),
        compiler_params=pltpu.CompilerParams(
            dimension_semantics=("parallel",)),
    )(x, packed["w_qkv_h"], packed["b_qkv_h"], packed["wo_h"], packed["vecs"])


# ---------------- pure-JAX reference (mirrors PyTorch semantics) ----------------
def self_attention_ref(x, params):
    d = x.shape[-1]
    mean = jnp.mean(x, axis=-1, keepdims=True)
    var = jnp.mean((x - mean) ** 2, axis=-1, keepdims=True)
    xn = (x - mean) / jnp.sqrt(var + LN_EPS)
    xn = xn * params["ln_weight"] + params["ln_bias"]

    w = params["in_proj_weight"]
    bqkv = params["in_proj_bias"]
    q = xn @ w[0 * d:1 * d].T + bqkv[0 * d:1 * d]
    k = xn @ w[1 * d:2 * d].T + bqkv[1 * d:2 * d]
    v = xn @ w[2 * d:3 * d].T + bqkv[2 * d:3 * d]

    def split(t):  # (B, S, D) -> (B, H, S, hd)
        bsz, ss, _ = t.shape
        return t.reshape(bsz, ss, N_HEAD, HEAD_DIM).transpose(0, 2, 1, 3)

    qh, kh, vh = split(q), split(k), split(v)
    scores = jnp.einsum("bhqd,bhkd->bhqk", qh, kh) / jnp.sqrt(jnp.float32(HEAD_DIM))
    p = jax.nn.softmax(scores, axis=-1)
    oh = jnp.einsum("bhqk,bhkd->bhqd", p, vh)
    attn = oh.transpose(0, 2, 1, 3).reshape(x.shape)
    out = attn @ params["out_proj_weight"].T + params["out_proj_bias"]
    return out + x


def make_params(key, d):
    ks = jax.random.split(key, 4)
    scale = 1.0 / jnp.sqrt(jnp.float32(d))
    return {
        "ln_weight": jnp.ones((d,), jnp.float32),
        "ln_bias": jnp.zeros((d,), jnp.float32),
        "in_proj_weight": jax.random.normal(ks[0], (3 * d, d), jnp.float32) * scale,
        "in_proj_bias": jax.random.normal(ks[1], (3 * d,), jnp.float32) * 0.02,
        "out_proj_weight": jax.random.normal(ks[2], (d, d), jnp.float32) * scale,
        "out_proj_bias": jax.random.normal(ks[3], (d,), jnp.float32) * 0.02,
    }


if __name__ == "__main__":
    key = jax.random.PRNGKey(0)
    kx, kp = jax.random.split(key)
    x = jax.random.normal(kx, (B, S, D), jnp.float32)
    params = make_params(kp, D)

    # one-time packing at parameter-load time (not on the per-call path)
    packed = pack_params(params, N_HEAD)

    out = self_attention_pallas(x, packed)
    out = jax.block_until_ready(out)

    ref = self_attention_ref(x, params)
    assert out.shape == ref.shape == (B, S, D)
    # tolerance loosened slightly (approx=True reciprocal on the EUP, ~2^-12 rel err)
    assert jnp.max(jnp.abs(out - ref)) < 5e-3, "mismatch vs pure-JAX reference"

    print("KERNEL_OK")
</pallas_src>

<mosaic_0001>
module attributes {stable_mosaic.version = 11 : i64} {
  func.func @_self_attention_kernel(%arg0: i32, %arg1: memref<1x8x32xf32, #tpu.memory_space<vmem>>, %arg2: memref<4x32x24xf32, #tpu.memory_space<vmem>>, %arg3: memref<4x1x24xf32, #tpu.memory_space<vmem>>, %arg4: memref<4x8x32xf32, #tpu.memory_space<vmem>>, %arg5: memref<3x32xf32, #tpu.memory_space<vmem>>, %arg6: memref<1x8x32xf32, #tpu.memory_space<vmem>>) attributes {dimension_semantics = [#tpu.dimension_semantics<parallel>], iteration_bounds = array<i64: 2>, scalar_prefetch = 0 : i64, scratch_operands = 0 : i64, tpu.core_type = #tpu.core_type<tc>, window_params = [{transform_indices = @transform_0, window_bounds = array<i64: 1, 8, 32>}, {pipeline_mode = #tpu.pipeline_mode<synchronous>, transform_indices = @transform_1, window_bounds = array<i64: 4, 32, 24>}, {pipeline_mode = #tpu.pipeline_mode<synchronous>, transform_indices = @transform_2, window_bounds = array<i64: 4, 1, 24>}, {pipeline_mode = #tpu.pipeline_mode<synchronous>, transform_indices = @transform_3, window_bounds = array<i64: 4, 8, 32>}, {pipeline_mode = #tpu.pipeline_mode<synchronous>, transform_indices = @transform_4, window_bounds = array<i64: 3, 32>}, {transform_indices = @transform_5, window_bounds = array<i64: 1, 8, 32>}]} {
    %c0 = arith.constant 0 : index
    %c0_0 = arith.constant 0 : index
    %c0_1 = arith.constant 0 : index
    %0 = vector.load %arg1[%c0, %c0_0, %c0_1] : memref<1x8x32xf32, #tpu.memory_space<vmem>>, vector<1x8x32xf32>
    %1 = vector.shape_cast %0 : vector<1x8x32xf32> to vector<8x32xf32>
    %c0_2 = arith.constant 0 : index
    %c0_3 = arith.constant 0 : index
    %2 = vector.load %arg5[%c0_2, %c0_3] : memref<3x32xf32, #tpu.memory_space<vmem>>, vector<1x32xf32>
    %c1 = arith.constant 1 : index
    %c0_4 = arith.constant 0 : index
    %3 = vector.load %arg5[%c1, %c0_4] : memref<3x32xf32, #tpu.memory_space<vmem>>, vector<1x32xf32>
    %c2 = arith.constant 2 : index
    %c0_5 = arith.constant 0 : index
    %4 = vector.load %arg5[%c2, %c0_5] : memref<3x32xf32, #tpu.memory_space<vmem>>, vector<1x32xf32>
    %cst = arith.constant dense<0.000000e+00> : vector<8xf32>
    %5 = vector.multi_reduction <add>, %1, %cst [1] : vector<8x32xf32> to vector<8xf32>
    %6 = vector.shape_cast %5 : vector<8xf32> to vector<8x1xf32>
    %cst_6 = arith.constant 3.200000e+01 : f32
    %7 = vector.broadcast %cst_6 : f32 to vector<8x1xf32>
    %8 = arith.divf %6, %7 : vector<8x1xf32>
    %9 = vector.broadcast %8 : vector<8x1xf32> to vector<8x32xf32>
    %10 = arith.subf %1, %9 : vector<8x32xf32>
    %11 = arith.mulf %10, %10 : vector<8x32xf32>
    %cst_7 = arith.constant dense<0.000000e+00> : vector<8xf32>
    %12 = vector.multi_reduction <add>, %11, %cst_7 [1] : vector<8x32xf32> to vector<8xf32>
    %13 = vector.shape_cast %12 : vector<8xf32> to vector<8x1xf32>
    %cst_8 = arith.constant 3.200000e+01 : f32
    %14 = vector.broadcast %cst_8 : f32 to vector<8x1xf32>
    %15 = arith.divf %13, %14 : vector<8x1xf32>
    %cst_9 = arith.constant 9.99999974E-6 : f32
    %16 = vector.broadcast %cst_9 : f32 to vector<8x1xf32>
    %17 = arith.addf %15, %16 : vector<8x1xf32>
    %18 = math.rsqrt %17 : vector<8x1xf32>
    %19 = vector.broadcast %18 : vector<8x1xf32> to vector<8x32xf32>
    %20 = arith.mulf %10, %19 : vector<8x32xf32>
    %21 = vector.broadcast %3 : vector<1x32xf32> to vector<8x32xf32>
    %22 = arith.mulf %20, %21 : vector<8x32xf32>
    %23 = vector.broadcast %4 : vector<1x32xf32> to vector<8x32xf32>
    %24 = arith.addf %22, %23 : vector<8x32xf32>
    %25 = vector.shape_cast %24 : vector<8x32xf32> to vector<1x8x32xf32>
    %26 = vector.shape_cast %25 : vector<1x8x32xf32> to vector<1x8x32xf32>
    %27 = vector.broadcast %26 : vector<1x8x32xf32> to vector<4x8x32xf32>
    %c0_10 = arith.constant 0 : index
    %c0_11 = arith.constant 0 : index
    %c0_12 = arith.constant 0 : index
    %28 = vector.load %arg2[%c0_10, %c0_11, %c0_12] : memref<4x32x24xf32, #tpu.memory_space<vmem>>, vector<4x32x24xf32>
    "tpu.trace_start"() <{level = 10 : i32, message = "hsd,hdf->hsf"}> : () -> ()
    %cst_13 = arith.constant dense<0.000000e+00> : vector<4x8x24xf32>
    %29 = tpu.matmul %27, %28, %cst_13 {dimension_numbers = #tpu.dot_dimension_numbers<[2], [1], [1], [2], [0, 0, 0, 1, 1, 2], [0], [0]>} : vector<4x8x32xf32>, vector<4x32x24xf32>, vector<4x8x24xf32> -> vector<4x8x24xf32>
    "tpu.trace_stop"() : () -> ()
    %c0_14 = arith.constant 0 : index
    %c0_15 = arith.constant 0 : index
    %c0_16 = arith.constant 0 : index
    %30 = vector.load %arg3[%c0_14, %c0_15, %c0_16] : memref<4x1x24xf32, #tpu.memory_space<vmem>>, vector<4x1x24xf32>
    %31 = vector.broadcast %30 : vector<4x1x24xf32> to vector<4x8x24xf32>
    %32 = arith.addf %29, %31 : vector<4x8x24xf32>
    %33 = vector.extract_strided_slice %32 {offsets = [0, 0, 0], sizes = [4, 8, 8], strides = [1, 1, 1]} : vector<4x8x24xf32> to vector<4x8x8xf32>
    %34 = vector.extract_strided_slice %32 {offsets = [0, 0, 8], sizes = [4, 8, 8], strides = [1, 1, 1]} : vector<4x8x24xf32> to vector<4x8x8xf32>
    %35 = vector.extract_strided_slice %32 {offsets = [0, 0, 16], sizes = [4, 8, 8], strides = [1, 1, 1]} : vector<4x8x24xf32> to vector<4x8x8xf32>
    "tpu.trace_start"() <{level = 10 : i32, message = "hqd,hkd->hqk"}> : () -> ()
    %cst_17 = arith.constant dense<0.000000e+00> : vector<4x8x8xf32>
    %36 = tpu.matmul %33, %34, %cst_17 {dimension_numbers = #tpu.dot_dimension_numbers<[2], [2], [1], [1], [0, 0, 0, 1, 1, 1], [0], [0]>} : vector<4x8x8xf32>, vector<4x8x8xf32>, vector<4x8x8xf32> -> vector<4x8x8xf32>
    "tpu.trace_stop"() : () -> ()
    %cst_18 = arith.constant dense<0xFF800000> : vector<4x8xf32>
    %37 = vector.multi_reduction <maximumf>, %36, %cst_18 [2] : vector<4x8x8xf32> to vector<4x8xf32>
    %38 = vector.shape_cast %37 : vector<4x8xf32> to vector<4x8x1xf32>
    %39 = vector.broadcast %38 : vector<4x8x1xf32> to vector<4x8x8xf32>
    %40 = arith.subf %36, %39 : vector<4x8x8xf32>
    %41 = math.exp %40 : vector<4x8x8xf32>
    %cst_19 = arith.constant dense<0.000000e+00> : vector<4x8xf32>
    %42 = vector.multi_reduction <add>, %41, %cst_19 [2] : vector<4x8x8xf32> to vector<4x8xf32>
    %43 = vector.shape_cast %42 : vector<4x8xf32> to vector<4x8x1xf32>
    %44 = tpu.reciprocal %43 {approx = true} : vector<4x8x1xf32> -> vector<4x8x1xf32>
    "tpu.trace_start"() <{level = 10 : i32, message = "hqk,hkd->hqd"}> : () -> ()
    %cst_20 = arith.constant dense<0.000000e+00> : vector<4x8x8xf32>
    %45 = tpu.matmul %41, %35, %cst_20 {dimension_numbers = #tpu.dot_dimension_numbers<[2], [1], [1], [2], [0, 0, 0, 1, 1, 2], [0], [0]>} : vector<4x8x8xf32>, vector<4x8x8xf32>, vector<4x8x8xf32> -> vector<4x8x8xf32>
    "tpu.trace_stop"() : () -> ()
    %46 = vector.broadcast %44 : vector<4x8x1xf32> to vector<4x8x8xf32>
    %47 = arith.mulf %45, %46 : vector<4x8x8xf32>
    %c0_21 = arith.constant 0 : index
    %c0_22 = arith.constant 0 : index
    %c0_23 = arith.constant 0 : index
    %48 = vector.load %arg4[%c0_21, %c0_22, %c0_23] : memref<4x8x32xf32, #tpu.memory_space<vmem>>, vector<4x8x32xf32>
    "tpu.trace_start"() <{level = 10 : i32, message = "hqd,hdo->hqo"}> : () -> ()
    %cst_24 = arith.constant dense<0.000000e+00> : vector<4x8x32xf32>
    %49 = tpu.matmul %47, %48, %cst_24 {dimension_numbers = #tpu.dot_dimension_numbers<[2], [1], [1], [2], [0, 0, 0, 1, 1, 2], [0], [0]>} : vector<4x8x8xf32>, vector<4x8x32xf32>, vector<4x8x32xf32> -> vector<4x8x32xf32>
    "tpu.trace_stop"() : () -> ()
    %cst_25 = arith.constant dense<0.000000e+00> : vector<8x32xf32>
    %50 = vector.multi_reduction <add>, %49, %cst_25 [0] : vector<4x8x32xf32> to vector<8x32xf32>
    %51 = vector.broadcast %2 : vector<1x32xf32> to vector<8x32xf32>
    %52 = arith.addf %50, %51 : vector<8x32xf32>
    %53 = arith.addf %52, %1 : vector<8x32xf32>
    %c0_26 = arith.constant 0 : index
    %c0_27 = arith.constant 0 : index
    %c0_28 = arith.constant 0 : index
    %54 = vector.load %arg6[%c0_26, %c0_27, %c0_28] : memref<1x8x32xf32, #tpu.memory_space<vmem>>, vector<1x8x32xf32>
    %55 = vector.shape_cast %54 : vector<1x8x32xf32> to vector<8x32xf32>
    %56 = vector.shape_cast %53 : vector<8x32xf32> to vector<1x8x32xf32>
    tpu.vector_store %arg6[%c0_26, %c0_27, %c0_28], %56 {strides = array<i32>} : memref<1x8x32xf32, #tpu.memory_space<vmem>>, vector<1x8x32xf32>,
    return
  }
  func.func @transform_0(%arg0: i32) -> (i32, i32, i32) {
    %c0_i32 = arith.constant 0 : i32
    %c0_i32_0 = arith.constant 0 : i32
    %c0_i32_1 = arith.constant 0 : i32
    return %arg0, %c0_i32, %c0_i32_0 : i32, i32, i32
  }
  func.func @transform_1(%arg0: i32) -> (i32, i32, i32) {
    %c0_i32 = arith.constant 0 : i32
    %c0_i32_0 = arith.constant 0 : i32
    %c0_i32_1 = arith.constant 0 : i32
    %c0_i32_2 = arith.constant 0 : i32
    return %c0_i32, %c0_i32_0, %c0_i32_1 : i32, i32, i32
  }
  func.func @transform_2(%arg0: i32) -> (i32, i32, i32) {
    %c0_i32 = arith.constant 0 : i32
    %c0_i32_0 = arith.constant 0 : i32
    %c0_i32_1 = arith.constant 0 : i32
    %c0_i32_2 = arith.constant 0 : i32
    return %c0_i32, %c0_i32_0, %c0_i32_1 : i32, i32, i32
  }
  func.func @transform_3(%arg0: i32) -> (i32, i32, i32) {
    %c0_i32 = arith.constant 0 : i32
    %c0_i32_0 = arith.constant 0 : i32
    %c0_i32_1 = arith.constant 0 : i32
    %c0_i32_2 = arith.constant 0 : i32
    return %c0_i32, %c0_i32_0, %c0_i32_1 : i32, i32, i32
  }
  func.func @transform_4(%arg0: i32) -> (i32, i32) {
    %c0_i32 = arith.constant 0 : i32
    %c0_i32_0 = arith.constant 0 : i32
    %c0_i32_1 = arith.constant 0 : i32
    return %c0_i32, %c0_i32_0 : i32, i32
  }
  func.func @transform_5(%arg0: i32) -> (i32, i32, i32) {
    %c0_i32 = arith.constant 0 : i32
    %c0_i32_0 = arith.constant 0 : i32
    %c0_i32_1 = arith.constant 0 : i32
    return %arg0, %c0_i32, %c0_i32_0 : i32, i32, i32
  }
}

</mosaic_0001>

<bundles_post_ra>
// kernel: tpu_custom_call.1
= control target key start
LH: loop header
LB: loop body
LE: loop exit
PB: predicated region body
PF: predicated region fallthrough
CT: control target
= control target key end

     0   :  { %10 = vsyncpa [#allocation3], 0  ;;  %s2231_s0 = inlined_call_operand.vmem [shape: f32[2,8,32], index: 0, kind: input, shape index: {}]   ;;  %s2232_s1 = inlined_call_operand.vmem [shape: f32[4,32,24], index: 1, kind: input, shape index: {}]   ;;  %s2233_s2 = inlined_call_operand.vmem [shape: f32[4,1,24], index: 2, kind: input, shape index: {}]   ;;  %s2234_s3 = inlined_call_operand.vmem [shape: f32[4,8,32], index: 3, kind: input, shape index: {}]   ;;  %s2235_s4 = inlined_call_operand.vmem [shape: f32[3,32], index: 4, kind: input, shape index: {}]   ;;  %s2236_s5 = inlined_call_operand.hbm [shape: f32[2,8,32], index: 5, kind: output, shape index: {}]  }
   0x1   :  { %12 = vsyncpa [#allocation3 + $0x1], 0  ;;  %s1959_s18 = smov 0   ;;  %s1961_s19 = smov 0  }
   0x2   :  { %s1963_s20 = smov 0   ;;  %s1965_s21 = smov 0  }
   0x3 LB: > { %s1980_s22 = sadd.s32 4294967295, %s1922_s21   ;;  %s1616_s23 = sadd.s32 4294967294, %s1922_s21   ;;  %s1922_s21 = sphi %s1965_s21, %s2242_s21   ;;  %s1918_s20 = sphi %s1963_s20, %s2241_s20   ;;  %s1914_s19 = sphi %s1961_s19, %s2240_s19   ;;  %s1910_s18 = sphi %s1959_s18, %s2239_s18  }
   0x4   : > { %s1984_s24 = sadd.s32 1, %s1922_s21   ;;  %s135_s25 = sadd.s32 1, %s1918_s20 }
   0x5   : > { %s132_s26 = ssub.s32 %s1922_s21, %s1984_s24  ;;  %p145_p0 = scmp.ne.s32.totalorder %s1918_s20, %s1914_s19 }
   0x6   : > { %p133_p1 = scmp.eq.s32.totalorder %s132_s26, 0  ;;  %p146_p2 = scmp.eq.s32.totalorder %s1980_s22, 1 }
   0x7   : > { %p151_p3 = scmp.ne.s32.totalorder %s1914_s19, %s1910_s18  ;;  %p152_p4 = scmp.eq.s32.totalorder %s1616_s23, 1 }
   0x8   : > { %s1995_s27 = scalar_select %p133_p1, %s1918_s20, %s135_s25  }
   0x9   : > { %p1997_p5 = por %p146_p2, %p145_p0  ;;  %p2001_p6 = por %p152_p4, %p151_p3 }
   0xa   : > { %p1619_p7 = scmp.ge.s32.totalorder %s1922_s21, 1  ;;  %p189_p8 = scmp.lt.s32.totalorder %s1922_s21, 3 }
   0xc   : > { %p190_p9 = pnand %p1619_p7, %p189_p8 }
   0xd   : > { %p216_p10 = scmp.lt.s32.totalorder (!%p190_p9), %s1980_s22, 1  ;;  %s1926_s23 = smov (!%p190_p9), 120  }
   0xe   : > { %193 = sbr.rel (%p190_p9) target bundleno = 1460 (0x5b4), region = 40  ;;  %s1927_s7 = smov (!%p190_p9), 112  }
   0xf   : > { %s213_s16 = sand.u32 (!%p190_p9), 1, %s1914_s19   ;;  %s1650_s26 = sshll.u32 (!%p190_p9), %s1980_s22, 7 }
  0x10   : > { %s1620_s17 = sshll.u32 (!%p190_p9), %s213_s16, 3  ;;  %s1544_s10 = scalar_lea.sflag (!%p190_p9), [#allocation3], %s213_s16 }
  0x11   : > { %s1928_s12 = smov (!%p190_p9), [#allocation2]  }
  0x13   : > { %s217_s30 = scalar_select %p216_p10, %s1980_s22, 1  ;;  %vm224_vm0 = vcmask 261120   ;;  %v252_v7 = vld [vmem:[%s2232_s1 + $0x18] sm:$0xff]  ;;  %v1924_v9 = vmov 0.0   ;;  %v251_v10 = vld [vmem:[%s2232_s1 + $0x10] sm:$0xff]  ;;  %v250_v12 = vld [vmem:[%s2232_s1 + $0x8] sm:$0xff] }
  0x14   : > { %v256_v8 = vld [vmem:[%s2232_s1 + $0x38] sm:$0xff]  ;;  %1697 = vmatprep.subr.mxu0 %v1924_v9  ;;  %1708 = vmatprep.subr.mxu1 %v1924_v9  ;;  %v255_v11 = vld [vmem:[%s2232_s1 + $0x30] sm:$0xff]  ;;  %v254_v13 = vld [vmem:[%s2232_s1 + $0x28] sm:$0xff]  ;;  %vm1925_vm1 = vmmov 0   ;;  %vm579_vm2 = vcmask 64512   ;;  %s1866_s22 = sshll.u32 %s1928_s12, 4  ;;  %s1867_s22 = int_to_ptr.vmem [resolvable:$false] %s1866_s22 }
  0x15   : > { %s1621_s6 = sshll.u32 %s217_s30, 3  ;;  %1698 = vmatpush3.msra.mxu0 %v252_v7  ;;  %1709 = vmatpush3.msra.mxu1 %v256_v8  ;;  %v249_v14 = vld [vmem:[%s2232_s1] sm:$0xff]  ;;  %v260_v25 = vld [vmem:[%s2232_s1 + $0x58] sm:$0xff]  ;;  %v259_v27 = vld [vmem:[%s2232_s1 + $0x50] sm:$0xff]  ;;  %s215_s30 = scalar_lea.vmem [#allocation2], %s1620_s17 }
  0x16   : > { %s219_s9 = scalar_lea.vmem %s2231_s0, %s1621_s6  ;;  %1699 = vmatprep.subr.mxu0 %v1924_v9  ;;  %1710 = vmatprep.subr.mxu1 %v1924_v9  ;;  %v253_v15 = vld [vmem:[%s2232_s1 + $0x20] sm:$0xff]  ;;  %v264_v26 = vld [vmem:[%s2232_s1 + $0x78] sm:$0xff]  ;;  %v263_v28 = vld [vmem:[%s2232_s1 + $0x70] sm:$0xff]  ;;  %s1557_s6 = sshll.u32 %s215_s30, 4  ;;  %s1558_s6 = int_to_ptr.vmem [resolvable:$true] %s1557_s6 }
  0x17   : > { %v2012_v0 = vld [vmem:[%s219_s9] sm:$0xff]  ;;  %1700 = vmatpush3.msra.mxu0 %v251_v10  ;;  %1711 = vmatpush3.msra.mxu1 %v255_v11  ;;  %v258_v29 = vld [vmem:[%s2232_s1 + $0x48] sm:$0xff]  ;;  %s1555_s9 = scalar_lea.hbm %s2236_s5, %s1650_s26  ;;  %s1862_s11 = scalar_lea.vmem %s1558_s6, 128 }
  0x18   : > { %v225_v1 = vsel %vm224_vm0, %v2012_v0, 0.0  ;;  %1701 = vmatprep.subr.mxu0 %v1924_v9  ;;  %1712 = vmatprep.subr.mxu1 %v1924_v9  ;;  %v1622_v20 = vld [vmem:[%s2235_s4 + $0x1] ss:$0 sm:$0xff]  ;;  %v1623_v22 = vld [vmem:[%s2235_s4 + $0x2] ss:$0 sm:$0xff]  ;;  %v262_v30 = vld [vmem:[%s2232_s1 + $0x68] sm:$0xff]  ;;  %p1863_p11 = scmp.ne.s32.totalorder %s1558_s6, %s1862_s11  ;;  %p1869_p0 = scmp.lt.s32.totalorder %s1558_s6, %s1867_s22 }
  0x19   : > { %226 = vadd.xlane.f32.xlu0 %v225_v1  ;;  %1702 = vmatpush3.msra.mxu0 %v250_v12  ;;  %v257_v31 = vld [vmem:[%s2232_s1 + $0x40] sm:$0xff]  ;;  %s1868_s13 = scalar_lea.vmem %s1867_s22, 256 }
  0x1a   : > { %1713 = vmatpush3.msra.mxu1 %v254_v13  ;;  %1703 = vmatprep.subr.mxu0 %v1924_v9  ;;  %v261_v32 = vld [vmem:[%s2232_s1 + $0x60] sm:$0xff]  ;;  %p1864_p12 = pnand %p1863_p11, %p1997_p5  ;;  %p1870_p1 = scmp.lt.s32.totalorder %s1868_s13, %s1862_s11 }
  0x1b   : > { %1714 = vmatprep.subr.mxu1 %v1924_v9  ;;  %1704 = vmatpush3.msra.mxu0 %v249_v14  ;;  %v1624_v33 = vld [vmem:[%s2233_s2] ss:$0 sm:$0xff]  ;;  %v1625_v37 = vld [vmem:[%s2233_s2 + $0x1] ss:$0 sm:$0xff]  ;;  %v1627_v41 = vld [vmem:[%s2233_s2 + $0x3] ss:$0 sm:$0xff] }
  0x1c   : > { %1715 = vmatpush3.msra.mxu1 %v253_v15  ;;  %1705 = vmatprep.mubr.msk.f32.mxu0 %vm1925_vm1, %v1924_v9  ;;  %v1626_v42 = vld [vmem:[%s2233_s2 + $0x2] ss:$0 sm:$0xff]  ;;  %p1865_p13 = pneg %p1864_p12  ;;  %p1871_p2 = por %p1870_p1, %p1869_p0 }
  0x1d   : > { %1716 = vmatprep.mubr.msk.f32.mxu1 %vm1925_vm1, %v1924_v9  ;;  %1719 = vmatprep.subr.mxu0 %v1924_v9 }
  0x1e   : > { %1730 = vmatprep.subr.mxu1 %v1924_v9  ;;  %p1872_p3 = pnand %p1871_p2, %p1865_p13 }
  0xa2   : > { %v227_v2 = vpop.xlane.xlu0 %226 }
  0xa3   : > { %v229_v3 = vmul.f32 0.03125, %v227_v2 }
  0xa5   : > { %v230_v4 = vsub.f32 %v2012_v0, %v229_v3 }
  0xa7   : > { %v231_v5 = vmul.f32 %v230_v4, %v230_v4 }
  0xa9   : > { %v232_v6 = vsel %vm224_vm0, %v231_v5, 0.0 }
  0xaa   : > { %233 = vadd.xlane.f32.xlu0 %v232_v6 }
 0x133   : > { %v234_v16 = vpop.xlane.xlu0 %233 }
 0x134   : > { %v235_v17 = vmul.f32 0.03125, %v234_v16 }
 0x136   : > { %v236_v18 = vadd.f32 1e-05, %v235_v17 }
 0x138   : > { %1844 = vrsqrt.f32 %v236_v18 }
 0x145   : > { %v1845_v19 = vpop.eup %1844 }
 0x146   : > { %v238_v21 = vmul.f32 %v1845_v19, %v230_v4 }
 0x148   : > { %v243_v23 = vmul.f32 %v1622_v20, %v238_v21 }
 0x14a   : > { %v248_v24 = vadd.f32 %v1623_v22, %v243_v23 }
 0x14c   : > { %1706 = vmatmul.mubr.msk.f32.vlgmr.msra.gmra.mxu0 %vm224_vm0, %v248_v24  ;;  %1717 = vmatmul.mubr.msk.f32.vlgmr.msra.gmra.mxu1 %vm224_vm0, %v248_v24 }
 0x14d   : > { %1720 = vmatpush3.msra.mxu0 %v260_v25  ;;  %1731 = vmatpush3.msra.mxu1 %v264_v26 }
 0x14e   : > { %1721 = vmatprep.subr.mxu0 %v1924_v9  ;;  %1732 = vmatprep.subr.mxu1 %v1924_v9 }
 0x14f   : > { %1722 = vmatpush3.msra.mxu0 %v259_v27  ;;  %1733 = vmatpush3.msra.mxu1 %v263_v28  ;;  %v1233_v27 = vld [vmem:[%s2234_s3] sm:$0xff]  ;;  %v1234_v28 = vld [vmem:[%s2234_s3 + $0x8] sm:$0xff] }
 0x150   : > { %1723 = vmatprep.subr.mxu0 %v1924_v9  ;;  %1734 = vmatprep.subr.mxu1 %v1924_v9 }
 0x151   : > { %1724 = vmatpush3.msra.mxu0 %v258_v29  ;;  %1735 = vmatpush3.msra.mxu1 %v262_v30 }
 0x152   : > { %1725 = vmatprep.subr.mxu0 %v1924_v9  ;;  %1736 = vmatprep.subr.mxu1 %v1924_v9 }
 0x153   : > { %1726 = vmatpush3.msra.mxu0 %v257_v31  ;;  %1727 = vmatprep.mubr.msk.f32.mxu0 %vm1925_vm1, %v1924_v9 }
 0x154   : > { %1737 = vmatpush3.msra.mxu1 %v261_v32  ;;  %1738 = vmatprep.mubr.msk.f32.mxu1 %vm1925_vm1, %v1924_v9 }
 0x155   : > { %1728 = vmatmul.mubr.msk.f32.vlgmr.msra.gmra.mxu0 %vm224_vm0, %v248_v24  ;;  %1739 = vmatmul.mubr.msk.f32.vlgmr.msra.gmra.mxu1 %vm224_vm0, %v248_v24 }
 0x156   : > { %1741 = vmatprep.subr.mxu0 %v1924_v9  ;;  %1743 = vmatprep.mubr.msk.f32.mxu0 %vm1925_vm1, %v1924_v9 }
 0x157   : > { %1746 = vmatprep.subr.mxu1 %v1924_v9  ;;  %1748 = vmatprep.mubr.msk.f32.mxu1 %vm1925_vm1, %v1924_v9 }
 0x20c   : > { %v362_v34 = vpop.f32.mrf.mxu0  ;;  %v432_v35 = vpop.f32.mrf.mxu1 }
 0x20d   : > { %v363_v36 = vadd.f32 %v1624_v33, %v362_v34  ;;  %v433_v40 = vadd.f32 %v1625_v37, %v432_v35  ;;  %v1235_v34 = vld [vmem:[%s2234_s3 + $0x10] sm:$0xff] }
 0x20e   : > { %v1707_v38 = vpop.f32.mrf.mxu0  ;;  %v1718_v39 = vpop.f32.mrf.mxu1 }
 0x20f   : > { %577 = vrot.lane.b32.xlu1 %v363_v36, %s1926_s23  ;;  %v1236_v39 = vld [vmem:[%s2234_s3 + $0x18] sm:$0xff] }
 0x213   : > { %655 = vrot.lane.b32.xlu1 %v433_v40, %s1926_s23 }
 0x215   : > { %v572_v43 = vpop.f32.mrf.mxu1  ;;  %v502_v44 = vpop.f32.mrf.mxu0 }
 0x216   : > { %v573_v45 = vadd.f32 %v1627_v41, %v572_v43  ;;  %v503_v46 = vadd.f32 %v1626_v42, %v502_v44 }
 0x217   : > { %v1729_v47 = vpop.f32.mrf.mxu0  ;;  %v1740_v48 = vpop.f32.mrf.mxu1 }
 0x218   : > { %732 = vrot.lane.b32.xlu0 %v503_v46, %s1926_s23  ;;  %809 = vrot.lane.b32.xlu1 %v573_v45, %s1926_s23 }
 0x21c   : > { %925 = vrot.lane.b32.xlu1 %v363_v36, %s1927_s7 }
 0x281   : > { %v578_v49 = vpop.permute.xlu1 %577 }
 0x282   : > { %1742 = vmatpush3.xpose.msk.msra.mxu0 %vm579_vm2, %v578_v49 }
 0x283   : > { %1751 = vmatprep.subr.mxu0 %v1924_v9 }
 0x285   : > { %1744 = vmatmul.mubr.msk.f32.vlgmr.msra.gmra.mxu0 %vm579_vm2, %v363_v36  ;;  %v656_v50 = vpop.permute.xlu1 %655 }
 0x286   : > { %1747 = vmatpush3.xpose.msk.msra.mxu1 %vm579_vm2, %v656_v50  ;;  %1753 = vmatprep.mubr.msk.f32.mxu0 %vm1925_vm1, %v1924_v9 }
 0x287   : > { %1756 = vmatprep.subr.mxu1 %v1924_v9 }
 0x289   : > { %1749 = vmatmul.mubr.msk.f32.vlgmr.msra.gmra.mxu1 %vm579_vm2, %v433_v40 }
 0x28a   : > { %v733_v51 = vpop.permute.xlu0 %732  ;;  %v810_v52 = vpop.permute.xlu1 %809  ;;  %1758 = vmatprep.mubr.msk.f32.mxu1 %vm1925_vm1, %v1924_v9 }
 0x28b   : > { %1752 = vmatpush3.xpose.msk.msra.mxu0 %vm579_vm2, %v733_v51  ;;  %1757 = vmatpush3.xpose.msk.msra.mxu1 %vm579_vm2, %v810_v52 }
 0x28c   : > { %1761 = vmatprep.subr.mxu0 %v1924_v9  ;;  %1766 = vmatprep.subr.mxu1 %v1924_v9 }
 0x28e   : > { %1754 = vmatmul.mubr.msk.f32.vlgmr.msra.gmra.mxu0 %vm579_vm2, %v503_v46  ;;  %1759 = vmatmul.mubr.msk.f32.vlgmr.msra.gmra.mxu1 %vm579_vm2, %v573_v45  ;;  %v926_v53 = vpop.permute.xlu1 %925 }
 0x28f   : > { %1762 = vmatpush3.msra.mxu0 %v926_v53  ;;  %1763 = vmatprep.mubr.msk.f32.mxu0 %vm1925_vm1, %v1924_v9 }
 0x290   : > { %1771 = vmatprep.subr.mxu0 %v1924_v9  ;;  %1768 = vmatprep.mubr.msk.f32.mxu1 %vm1925_vm1, %v1924_v9 }
 0x345   : > { %v650_v54 = vpop.f32.mrf.mxu0 }
 0x346   : > { %v885_v55 = vsel %vm579_vm2, %v650_v54, -inf }
 0x347   : > { %886 = vmax.xlane.f32.xlu1 %v885_v55  ;;  %v1745_v56 = vpop.f32.mrf.mxu0 }
 0x349   : > { %v727_v57 = vpop.f32.mrf.mxu1 }
 0x34a   : > { %v888_v58 = vsel %vm579_vm2, %v727_v57, -inf }
 0x34b   : > { %v1750_v59 = vpop.f32.mrf.mxu1  ;;  %889 = vmax.xlane.f32.xlu0 %v888_v58 }
 0x34e   : > { %v804_v60 = vpop.f32.mrf.mxu0  ;;  %v881_v61 = vpop.f32.mrf.mxu1 }
 0x34f   : > { %v891_v1 = vsel %vm579_vm2, %v804_v60, -inf  ;;  %v894_v2 = vsel %vm579_vm2, %v881_v61, -inf }
 0x350   : > { %v1755_v62 = vpop.f32.mrf.mxu0  ;;  %v1760_v63 = vpop.f32.mrf.mxu1 }
 0x351   : > { %v1648_v62 = vld [vmem:[%s2235_s4] ss:$0 sm:$0xff] }
 0x358   : > { %1077 = vrot.lane.b32.xlu1 %v503_v46, %s1927_s7 }
 0x361   : > { %1001 = vrot.lane.b32.xlu0 %v433_v40, %s1927_s7 }
 0x37c   : > { %892 = vmax.xlane.f32.xlu1 %v891_v1 }
 0x380   : > { %895 = vmax.xlane.f32.xlu1 %v894_v2 }
 0x391   : > { %1153 = vrot.lane.b32.xlu1 %v573_v45, %s1927_s7 }
 0x3d0   : > { %v887_v3 = vpop.xlane.xlu1 %886 }
 0x3d1   : > { %v897_v4 = vsub.f32 %v650_v54, %v887_v3 }
 0x3d3   : > { %v901_v5 = vmul.f32 1.442695, %v897_v4 }
 0x3d4   : > { %v890_v6 = vpop.xlane.xlu0 %889  ;;  %v1078_v12 = vpop.permute.xlu1 %1077 }
 0x3d5   : > { %1846 = vpow2.f32 %v901_v5  ;;  %v898_v7 = vsub.f32 %v727_v57, %v890_v6 }
 0x3d7   : > { %v903_v8 = vmul.f32 1.442695, %v898_v7 }
 0x3d8   : > { %v1002_v10 = vpop.permute.xlu0 %1001 }
 0x3d9   : > { %1848 = vpow2.f32 %v903_v8  ;;  %1767 = vmatpush3.msra.mxu1 %v1002_v10 }
 0x3da   : > { %1776 = vmatprep.subr.mxu1 %v1924_v9 }
 0x3e2   : > { %v1847_v11 = vpop.eup %1846 }
 0x3e3   : > { %1764 = vmatmul.mubr.msk.f32.vlgmr.msra.gmra.mxu0 %vm579_vm2, %v1847_v11  ;;  %v909_v13 = vsel %vm579_vm2, %v1847_v11, 0.0 }
 0x3e4   : > { %1772 = vmatpush3.msra.mxu0 %v1078_v12  ;;  %910 = vadd.xlane.f32.xlu1 %v909_v13 }
 0x3e5   : > { %1773 = vmatprep.mubr.msk.f32.mxu0 %vm1925_vm1, %v1924_v9  ;;  %1781 = vmatprep.subr.mxu0 %v1924_v9 }
 0x3e6   : > { %v1849_v14 = vpop.eup %1848 }
 0x3e7   : > { %1769 = vmatmul.mubr.msk.f32.vlgmr.msra.gmra.mxu1 %vm579_vm2, %v1849_v14  ;;  %v912_v15 = vsel %vm579_vm2, %v1849_v14, 0.0 }
 0x3e8   : > { %913 = vadd.xlane.f32.xlu0 %v912_v15  ;;  %1778 = vmatprep.mubr.msk.f32.mxu1 %vm1925_vm1, %v1924_v9 }
 0x405   : > { %v893_v16 = vpop.xlane.xlu1 %892 }
 0x406   : > { %v899_v17 = vsub.f32 %v804_v60, %v893_v16 }
 0x408   : > { %v905_v18 = vmul.f32 1.442695, %v899_v17 }
 0x409   : > { %v896_v19 = vpop.xlane.xlu1 %895 }
 0x40a   : > { %1850 = vpow2.f32 %v905_v18  ;;  %v900_v20 = vsub.f32 %v881_v61, %v896_v19 }
 0x40c   : > { %v907_v21 = vmul.f32 1.442695, %v900_v20 }
 0x40d   : > { %v1154_v22 = vpop.permute.xlu1 %1153 }
 0x40e   : > { %1852 = vpow2.f32 %v907_v21  ;;  %1777 = vmatpush3.msra.mxu1 %v1154_v22 }
 0x40f   : > { %1786 = vmatprep.subr.mxu1 %v1924_v9 }
 0x417   : > { %v1851_v23 = vpop.eup %1850 }
 0x418   : > { %1774 = vmatmul.mubr.msk.f32.vlgmr.msra.gmra.mxu0 %vm579_vm2, %v1851_v23  ;;  %v915_v24 = vsel %vm579_vm2, %v1851_v23, 0.0 }
 0x419   : > { %916 = vadd.xlane.f32.xlu0 %v915_v24  ;;  %1783 = vmatprep.mubr.msk.f32.mxu0 %vm1925_vm1, %v1924_v9 }
 0x41a   : > { %1782 = vmatpush3.msra.mxu0 %v1233_v27 }
 0x41b   : > { %v1853_v25 = vpop.eup %1852  ;;  %1791 = vmatprep.subr.mxu0 %v1924_v9 }
 0x41c   : > { %1779 = vmatmul.mubr.msk.f32.vlgmr.msra.gmra.mxu1 %vm579_vm2, %v1853_v25  ;;  %v918_v26 = vsel %vm579_vm2, %v1853_v25, 0.0 }
 0x41d   : > { %919 = vadd.xlane.f32.xlu1 %v918_v26  ;;  %1788 = vmatprep.mubr.msk.f32.mxu1 %vm1925_vm1, %v1924_v9 }
 0x41e   : > { %1787 = vmatpush3.msra.mxu1 %v1234_v28 }
 0x41f   : > { %1796 = vmatprep.subr.mxu1 %v1924_v9 }
 0x46d   : > { %v911_v29 = vpop.xlane.xlu1 %910 }
 0x46e   : > { %1854 = vrcp.f32 %v911_v29 }
 0x471   : > { %v914_v30 = vpop.xlane.xlu0 %913 }
 0x472   : > { %1856 = vrcp.f32 %v914_v30 }
 0x47b   : > { %v1855_v31 = vpop.eup %1854 }
 0x47f   : > { %v1857_v36 = vpop.eup %1856 }
 0x4a2   : > { %v917_v41 = vpop.xlane.xlu0 %916 }
 0x4a3   : > { %v997_v32 = vpop.f32.mrf.mxu0  ;;  %1858 = vrcp.f32 %v917_v41 }
 0x4a4   : > { %v1229_v33 = vmul.f32 %v1855_v31, %v997_v32 }
 0x4a5   : > { %v1765_v35 = vpop.f32.mrf.mxu0 }
 0x4a6   : > { %1784 = vmatmul.mubr.msk.f32.vlgmr.msra.gmra.mxu0 %vm579_vm2, %v1229_v33  ;;  %v920_v42 = vpop.xlane.xlu1 %919 }
 0x4a7   : > { %v1073_v37 = vpop.f32.mrf.mxu1  ;;  %1792 = vmatpush3.msra.mxu0 %v1235_v34  ;;  %1793 = vmatprep.mubr.msk.f32.mxu0 %vm1925_vm1, %v1924_v9  ;;  %1860 = vrcp.f32 %v920_v42 }
 0x4a8   : > { %v1230_v38 = vmul.f32 %v1857_v36, %v1073_v37 }
 0x4a9   : > { %v1770_v40 = vpop.f32.mrf.mxu1 }
 0x4aa   : > { %1789 = vmatmul.mubr.msk.f32.vlgmr.msra.gmra.mxu1 %vm579_vm2, %v1230_v38 }
 0x4ab   : > { %1797 = vmatpush3.msra.mxu1 %v1236_v39  ;;  %1798 = vmatprep.mubr.msk.f32.mxu1 %vm1925_vm1, %v1924_v9 }
 0x4b0   : > { %v1859_v43 = vpop.eup %1858 }
 0x4b4   : > { %v1861_v47 = vpop.eup %1860 }
 0x4d8   : > { %v1149_v44 = vpop.f32.mrf.mxu0 }
 0x4d9   : > { %v1231_v45 = vmul.f32 %v1859_v43, %v1149_v44 }
 0x4da   : > { %v1775_v46 = vpop.f32.mrf.mxu0 }
 0x4db   : > { %1794 = vmatmul.mubr.msk.f32.vlgmr.msra.gmra.mxu0 %vm579_vm2, %v1231_v45 }
 0x4dc   : > { %v1225_v48 = vpop.f32.mrf.mxu1 }
 0x4dd   : > { %v1232_v49 = vmul.f32 %v1861_v47, %v1225_v48 }
 0x4de   : > { %v1780_v50 = vpop.f32.mrf.mxu1 }
 0x4df   : > { %1799 = vmatmul.mubr.msk.f32.vlgmr.msra.gmra.mxu1 %vm579_vm2, %v1232_v49 }
 0x566   : > { %v1306_v51 = vpop.f32.mrf.mxu0 }
 0x567   : > { %v1529_v56 = vsel %vm224_vm0, %v1306_v51, 0.0 }
 0x568   : > { %v1785_v52 = vpop.f32.mrf.mxu0 }
 0x56a   : > { %v1379_v9 = vpop.f32.mrf.mxu1 }
 0x56b   : > { %v1530_v54 = vsel %vm224_vm0, %v1379_v9, 0.0 }
 0x56c   : > { %v1790_v53 = vpop.f32.mrf.mxu1  ;;  %v1531_v58 = vadd.f32 %v1530_v54, %v1529_v56 }
 0x59b   : > { %v1452_v55 = vpop.f32.mrf.mxu0 }
 0x59c   : > { %v1532_v57 = vsel %vm224_vm0, %v1452_v55, 0.0 }
 0x59d   : > { %v1795_v59 = vpop.f32.mrf.mxu0  ;;  %v1533_v60 = vadd.f32 %v1532_v57, %v1531_v58 }
 0x59f   : > { %v1525_v61 = vpop.f32.mrf.mxu1 }
 0x5a0   : > { %v1534_v63 = vsel %vm224_vm0, %v1525_v61, 0.0 }
 0x5a1   : > { %v1535_v1 = vadd.f32 %v1534_v63, %v1533_v60  ;;  %v1800_v2 = vpop.f32.mrf.mxu1 }
 0x5a3   : > { %v1540_v3 = vadd.f32 %v1648_v62, %v1535_v1 }
 0x5a5   : > { %v1541_v4 = vadd.f32 %v1540_v3, %v2012_v0 }
 0x5a7   : > { %1542 = vst.msk [vmem:[%s215_s30] sm:$0xff] %vm224_vm0, %v1541_v4 }
 0x5a8   : > { %1875 = shalt.err (!%p1872_p3)
}
 0x5a9   : > { %s1876_s14 = scalar_lea.hbm %s1555_s9, 128  ;;  %s1880_s17 = scalar_lea.hbm %s2236_s5, 256 }
 0x5aa   : > { %p1877_p4 = scmp.ne.s32.totalorder %s1555_s9, %s1876_s14  ;;  %p1881_p9 = scmp.lt.s32.totalorder %s1555_s9, %s2236_s5 }
 0x5ab   : > { %p1882_p10 = scmp.lt.s32.totalorder %s1880_s17, %s1876_s14 }
 0x5ac   : > { %p1878_p7 = pnand %p1877_p4, %p1997_p5 }
 0x5ad   : > { %p1883_p11 = por %p1882_p10, %p1881_p9 }
 0x5ae   : > { %p1879_p8 = pneg %p1878_p7 }
 0x5b0   : > { %p1884_p12 = pnand %p1883_p11, %p1879_p8 }
 0x5b2   : > { %1887 = shalt.err (!%p1884_p12)
}
 0x5b3   : > { %1801 = dma.vmem_to_hbm [thread:$0]  (%p1997_p5), %s1558_s6, 128, %s1555_s9, %s1544_s10  }
 0x5b4 PF: > { %p1807_p13 = scmp.ge.s32.totalorder %s1922_s21, 2  ;;  %s1569_s26 = sand.u32 1, %s1910_s18  }
 0x5b5   : > { %s1570_s30 = scalar_lea.sflag [#allocation3], %s1569_s26 }
 0x5b6   : > { %p1804_p0 = pnand %p1807_p13, %p2001_p6 }
 0x5b8   : > { %p1805_p1 = pneg %p1804_p0 }
 0x5ba   : > { %1905 = dma.done.wait (%p1805_p1), %s1570_s30, 128  }
 0x5bb   : > { %1907 = vsyncadd (%p1805_p1), %s1570_s30, 4294967168  ;;  %p15_p2 = scmp.ge.s32.totalorder %s1984_s24, 4   ;;  %s2239_s18 = smov %s1914_s19 }
 0x5bc   : > { %s2240_s19 = smov %s1918_s20  ;;  %s2241_s20 = smov %s1995_s27 }
 0x5bd   : > { %s2242_s21 = smov %s1984_s24  ;;  %17 = sbr.rel (!%p15_p2) target bundleno = 3 (0x3), region = 75 }
 0x5c2   :  { %1575 = vsyncpa [#allocation3], 1 }
 0x5c3   :  { %1577 = vsyncpa [#allocation3 + $0x1], 1 }

</bundles_post_ra>
